<compile_context>
chip_gen: v6e
topology: v6e:2x2x1
jax: 0.10.0
libtpu: 0.0.40
codegen_flags: <defaults>
</compile_context>

<pallas_src>
import jax
import jax.numpy as jnp
from jax.experimental import pallas as pl
from jax.experimental.pallas import tpu as pltpu


KPAD = 128      # padded im2col depth  (C*9 -> 128)
OPAD = 128      # padded conv output channels (O -> 128)
CPAD = 128      # padded number of classes (num_classes -> 128)


# ----------------------------- Pallas kernels ------------------------------

def conv_relu_pool_kernel(p00_ref, p01_ref, p10_ref, p11_ref, w_ref, b_ref, o_ref):
    """Fused Conv2d(3x3, same) + ReLU + MaxPool2d(2).

    p??_ref : (TM, KPAD)  bf16 im2col patches, one per tap of each 2x2 window
    w_ref   : (KPAD, OPAD) bf16 conv weight (zero padded)
    b_ref   : (1, OPAD)    f32 conv bias (zero padded)
    o_ref   : (TM, OPAD)   bf16 pooled features, rows ordered (n, hp, wp)
    """
    w = w_ref[...]
    b = b_ref[...]

    def tap(p_ref):
        acc = jnp.dot(p_ref[...], w, preferred_element_type=jnp.float32)
        return jnp.maximum(acc + b, 0.0)          # bias + ReLU in f32

    pooled = jnp.maximum(jnp.maximum(tap(p00_ref), tap(p01_ref)),
                         jnp.maximum(tap(p10_ref), tap(p11_ref)))
    o_ref[...] = pooled.astype(o_ref.dtype)


def linear_softmax_kernel(x_ref, w_ref, b_ref, o_ref):
    """Linear + Softmax(dim=1).  Class dim padded to 128 lanes; padded classes
    carry bias -1e30 so they vanish under softmax."""
    logits = jnp.dot(x_ref[...], w_ref[...], preferred_element_type=jnp.float32)
    logits = logits + b_ref[...]
    m = jnp.max(logits, axis=-1, keepdims=True)
    e = jnp.exp(logits - m)
    denom = jnp.sum(e, axis=-1, keepdims=True)
    o_ref[...] = (e * pl.reciprocal(denom, approx=True)).astype(o_ref.dtype)


# ------------------------------ param prep ---------------------------------

def prepare_params(params, *, C, H, W):
    """One-time repack of PyTorch-layout params into kernel-friendly padded /
    permuted bf16 layouts (zero runtime cost per forward)."""
    w_conv, b_conv, w_fc, b_fc = params
    O = w_conv.shape[0]
    num_classes = w_fc.shape[1]
    Hp, Wp = H // 2, W // 2
    k = C * 9

    # Conv weight (O, C, 3, 3) -> (C*9, O) -> zero pad to (KPAD, OPAD), bf16.
    w_mat = w_conv.reshape(O, k).T
    w_conv_p = jnp.zeros((KPAD, OPAD), jnp.float32).at[:k, :O].set(w_mat)
    w_conv_p = w_conv_p.astype(jnp.bfloat16)
    b_conv_p = jnp.zeros((1, OPAD), jnp.float32).at[0, :O].set(b_conv)

    # Classifier weight: permute rows from PyTorch's (o, hp, wp) flatten order
    # to the kernel's (hp, wp, o[+pad]) order; zero pad channels and classes.
    w_fc_r = w_fc.reshape(O, Hp, Wp, num_classes).transpose(1, 2, 0, 3)
    w_fc_p = jnp.zeros((Hp, Wp, OPAD, CPAD), jnp.float32)
    w_fc_p = w_fc_p.at[:, :, :O, :num_classes].set(w_fc_r)
    w_fc_p = w_fc_p.reshape(Hp * Wp * OPAD, CPAD).astype(jnp.bfloat16)

    # Padded classes get a huge negative bias so softmax ignores them.
    b_fc_p = jnp.full((1, CPAD), -1e30, jnp.float32).at[0, :num_classes].set(b_fc)

    return (w_conv_p, b_conv_p, w_fc_p, b_fc_p)


# ------------------------------ JAX glue -----------------------------------

def _pool_tap_patches(x_nchw):
    """(N,C,H,W) -> four (N*Hp*Wp, KPAD) bf16 patch matrices, one per tap of
    each 2x2 pool window, rows ordered (n, hp, wp); columns ordered (c, kh, kw)
    to match PyTorch conv-weight flattening; zero padded C*9 -> KPAD."""
    N, C, H, W = x_nchw.shape
    Hp, Wp = H // 2, W // 2
    k = C * 9
    xp = jnp.pad(x_nchw, ((0, 0), (0, 0), (1, 1), (1, 1)))
    cols = [xp[:, :, i:i + H, j:j + W] for i in range(3) for j in range(3)]
    patches = jnp.stack(cols, axis=-1)                 # (N, C, H, W, 9)
    patches = patches.transpose(0, 2, 3, 1, 4)         # (N, H, W, C, 9)
    patches = patches.reshape(N, H, W, k)
    taps = []
    for a in range(2):
        for b in range(2):
            t = patches[:, a::2, b::2, :].reshape(N * Hp * Wp, k)
            t = jnp.pad(t, ((0, 0), (0, KPAD - k))).astype(jnp.bfloat16)
            taps.append(t)
    return taps


def nima_forward(x_nchw, prepared_params, *, num_classes):
    """Forward pass: features(x) -> flatten -> dropout -> linear -> softmax."""
    N, C, H, W = x_nchw.shape
    Hp, Wp = H // 2, W // 2
    w_conv_p, b_conv_p, w_fc_p, b_fc_p = prepared_params

    # ---- features: fused Conv2d(C,O,3,pad=1) + ReLU + MaxPool2d(2) ----
    p00, p01, p10, p11 = _pool_tap_patches(x_nchw)
    M = N * Hp * Wp
    tm = min(512, M)                       # (tm, 128) tiles are (8,128)-aligned
    grid_m = pl.cdiv(M, tm)

    row_spec = pl.BlockSpec((tm, KPAD), lambda i: (i, 0))
    w_spec = pl.BlockSpec((KPAD, OPAD), lambda i: (0, 0))
    b_spec = pl.BlockSpec((1, OPAD), lambda i: (0, 0))
    out_spec = pl.BlockSpec((tm, OPAD), lambda i: (i, 0))

    feat = pl.pallas_call(
        conv_relu_pool_kernel,
        out_shape=jax.ShapeDtypeStruct((M, OPAD), jnp.bfloat16),
        grid=(grid_m,),
        in_specs=[row_spec, row_spec, row_spec, row_spec, w_spec, b_spec],
        out_specs=out_spec,
        compiler_params=pltpu.CompilerParams(
            dimension_semantics=("parallel",)),   # 2x on v7x (2 TCs); no-op v5e/v6e
    )(p00, p01, p10, p11, w_conv_p, b_conv_p)     # (M, OPAD) bf16, lane dense

    # ---- flatten: rows already (n, hp, wp); contiguous reshape, no transpose ----
    flat = feat.reshape(N, Hp * Wp * OPAD)
    F_pad = flat.shape[1]

    # ---- classifier: Dropout(0.75) -> Linear -> Softmax(dim=1) ----
    # TODO(synk): Dropout(p=0.75) is identity in eval/inference mode; training-mode
    # RNG dropout (pltpu.prng_seed/prng_random_bits + 1/(1-p) scale) not implemented.
    # TODO(synk): at the real F=86528, tile this matmul over F with an "arbitrary"
    # grid axis + f32 VMEM accumulator instead of a single full block.
    probs_padded = pl.pallas_call(
        linear_softmax_kernel,
        out_shape=jax.ShapeDtypeStruct((N, CPAD), jnp.float32),
        in_specs=[pl.BlockSpec((N, F_pad), lambda: (0, 0)),
                  pl.BlockSpec((F_pad, CPAD), lambda: (0, 0)),
                  pl.BlockSpec((1, CPAD), lambda: (0, 0))],
        out_specs=pl.BlockSpec((N, CPAD), lambda: (0, 0)),
    )(flat, w_fc_p, b_fc_p)

    return probs_padded[:, :num_classes]


# ------------------------------ reference ----------------------------------

def nima_reference(x, params):
    """Pure-JAX f32 reference matching the PyTorch stand-in module."""
    w_conv, b_conv, w_fc, b_fc = params
    y = jax.lax.conv_general_dilated(
        x, w_conv, window_strides=(1, 1), padding="SAME",
        dimension_numbers=("NCHW", "OIHW", "NCHW"))
    y = jnp.maximum(y + b_conv[None, :, None, None], 0.0)
    n, o, h, w = y.shape
    y = y.reshape(n, o, h // 2, 2, w // 2, 2).max(axis=(3, 5))
    flat = y.reshape(n, -1)
    logits = flat @ w_fc + b_fc
    return jax.nn.softmax(logits, axis=-1)


# ------------------------------- main ---------------------------------------

if __name__ == "__main__":
    key = jax.random.PRNGKey(0)
    k_x, k_wc, k_bc, k_wf, k_bf = jax.random.split(key, 5)

    # Small shapes consistent with the module's structure.
    N, C, H, W = 2, 4, 16, 16
    O = 8                        # conv output channels
    num_classes = 5
    F_in = O * (H // 2) * (W // 2)   # 512 (stand-in for the real 86528)

    x = jax.random.normal(k_x, (N, C, H, W), dtype=jnp.float32)
    w_conv = jax.random.normal(k_wc, (O, C, 3, 3), dtype=jnp.float32) * 0.1
    b_conv = jax.random.normal(k_bc, (O,), dtype=jnp.float32) * 0.1
    w_fc = jax.random.normal(k_wf, (F_in, num_classes), dtype=jnp.float32) * 0.05
    b_fc = jax.random.normal(k_bf, (num_classes,), dtype=jnp.float32) * 0.05
    params = (w_conv, b_conv, w_fc, b_fc)

    prepared = prepare_params(params, C=C, H=H, W=W)
    out = nima_forward(x, prepared, num_classes=num_classes)
    out = jax.block_until_ready(out)

    assert out.shape == (N, num_classes)
    # Softmax rows sum to 1 (approx reciprocal -> slightly loose tolerance).
    assert bool(jnp.all(jnp.abs(jnp.sum(out, axis=-1) - 1.0) < 1e-2))
    # Matches the pure-JAX f32 reference (bf16 MXU operands -> loose tolerance).
    ref = nima_reference(x, params)
    assert bool(jnp.all(jnp.abs(out - ref) < 5e-2))
    print("KERNEL_OK")
</pallas_src>

<mosaic_0001>
module attributes {stable_mosaic.version = 11 : i64} {
  func.func @conv_relu_pool_kernel(%arg0: i32, %arg1: memref<128x128xbf16, #tpu.memory_space<vmem>>, %arg2: memref<128x128xbf16, #tpu.memory_space<vmem>>, %arg3: memref<128x128xbf16, #tpu.memory_space<vmem>>, %arg4: memref<128x128xbf16, #tpu.memory_space<vmem>>, %arg5: memref<128x128xbf16, #tpu.memory_space<vmem>>, %arg6: memref<1x128xf32, #tpu.memory_space<vmem>>, %arg7: memref<128x128xbf16, #tpu.memory_space<vmem>>) attributes {dimension_semantics = [#tpu.dimension_semantics<parallel>], iteration_bounds = array<i64: 1>, scalar_prefetch = 0 : i64, scratch_operands = 0 : i64, tpu.core_type = #tpu.core_type<tc>, window_params = [{transform_indices = @transform_0, window_bounds = array<i64: 128, 128>}, {transform_indices = @transform_1, window_bounds = array<i64: 128, 128>}, {transform_indices = @transform_2, window_bounds = array<i64: 128, 128>}, {transform_indices = @transform_3, window_bounds = array<i64: 128, 128>}, {pipeline_mode = #tpu.pipeline_mode<synchronous>, transform_indices = @transform_4, window_bounds = array<i64: 128, 128>}, {pipeline_mode = #tpu.pipeline_mode<synchronous>, transform_indices = @transform_5, window_bounds = array<i64: 1, 128>}, {transform_indices = @transform_6, window_bounds = array<i64: 128, 128>}]} {
    %c0 = arith.constant 0 : index
    %c0_0 = arith.constant 0 : index
    %0 = vector.load %arg5[%c0, %c0_0] : memref<128x128xbf16, #tpu.memory_space<vmem>>, vector<128x128xbf16>
    %c0_1 = arith.constant 0 : index
    %c0_2 = arith.constant 0 : index
    %1 = vector.load %arg6[%c0_1, %c0_2] : memref<1x128xf32, #tpu.memory_space<vmem>>, vector<1x128xf32>
    %c0_3 = arith.constant 0 : index
    %c0_4 = arith.constant 0 : index
    %2 = vector.load %arg1[%c0_3, %c0_4] : memref<128x128xbf16, #tpu.memory_space<vmem>>, vector<128x128xbf16>
    %cst = arith.constant dense<0.000000e+00> : vector<128x128xf32>
    %3 = tpu.matmul %2, %0, %cst {dimension_numbers = #tpu.dot_dimension_numbers<[1], [0], [0], [1], [0, 0, 1, 1], [], []>} : vector<128x128xbf16>, vector<128x128xbf16>, vector<128x128xf32> -> vector<128x128xf32>
    %4 = vector.broadcast %1 : vector<1x128xf32> to vector<128x128xf32>
    %5 = arith.addf %3, %4 : vector<128x128xf32>
    %cst_5 = arith.constant 0.000000e+00 : f32
    %6 = vector.broadcast %cst_5 : f32 to vector<128x128xf32>
    %7 = arith.maximumf %5, %6 : vector<128x128xf32>
    %c0_6 = arith.constant 0 : index
    %c0_7 = arith.constant 0 : index
    %8 = vector.load %arg2[%c0_6, %c0_7] : memref<128x128xbf16, #tpu.memory_space<vmem>>, vector<128x128xbf16>
    %cst_8 = arith.constant dense<0.000000e+00> : vector<128x128xf32>
    %9 = tpu.matmul %8, %0, %cst_8 {dimension_numbers = #tpu.dot_dimension_numbers<[1], [0], [0], [1], [0, 0, 1, 1], [], []>} : vector<128x128xbf16>, vector<128x128xbf16>, vector<128x128xf32> -> vector<128x128xf32>
    %10 = vector.broadcast %1 : vector<1x128xf32> to vector<128x128xf32>
    %11 = arith.addf %9, %10 : vector<128x128xf32>
    %cst_9 = arith.constant 0.000000e+00 : f32
    %12 = vector.broadcast %cst_9 : f32 to vector<128x128xf32>
    %13 = arith.maximumf %11, %12 : vector<128x128xf32>
    %14 = arith.maximumf %7, %13 : vector<128x128xf32>
    %c0_10 = arith.constant 0 : index
    %c0_11 = arith.constant 0 : index
    %15 = vector.load %arg3[%c0_10, %c0_11] : memref<128x128xbf16, #tpu.memory_space<vmem>>, vector<128x128xbf16>
    %cst_12 = arith.constant dense<0.000000e+00> : vector<128x128xf32>
    %16 = tpu.matmul %15, %0, %cst_12 {dimension_numbers = #tpu.dot_dimension_numbers<[1], [0], [0], [1], [0, 0, 1, 1], [], []>} : vector<128x128xbf16>, vector<128x128xbf16>, vector<128x128xf32> -> vector<128x128xf32>
    %17 = vector.broadcast %1 : vector<1x128xf32> to vector<128x128xf32>
    %18 = arith.addf %16, %17 : vector<128x128xf32>
    %cst_13 = arith.constant 0.000000e+00 : f32
    %19 = vector.broadcast %cst_13 : f32 to vector<128x128xf32>
    %20 = arith.maximumf %18, %19 : vector<128x128xf32>
    %c0_14 = arith.constant 0 : index
    %c0_15 = arith.constant 0 : index
    %21 = vector.load %arg4[%c0_14, %c0_15] : memref<128x128xbf16, #tpu.memory_space<vmem>>, vector<128x128xbf16>
    %cst_16 = arith.constant dense<0.000000e+00> : vector<128x128xf32>
    %22 = tpu.matmul %21, %0, %cst_16 {dimension_numbers = #tpu.dot_dimension_numbers<[1], [0], [0], [1], [0, 0, 1, 1], [], []>} : vector<128x128xbf16>, vector<128x128xbf16>, vector<128x128xf32> -> vector<128x128xf32>
    %23 = vector.broadcast %1 : vector<1x128xf32> to vector<128x128xf32>
    %24 = arith.addf %22, %23 : vector<128x128xf32>
    %cst_17 = arith.constant 0.000000e+00 : f32
    %25 = vector.broadcast %cst_17 : f32 to vector<128x128xf32>
    %26 = arith.maximumf %24, %25 : vector<128x128xf32>
    %27 = arith.maximumf %20, %26 : vector<128x128xf32>
    %28 = arith.maximumf %14, %27 : vector<128x128xf32>
    %29 = arith.truncf %28 : vector<128x128xf32> to vector<128x128xbf16>
    %c0_18 = arith.constant 0 : index
    %c0_19 = arith.constant 0 : index
    %30 = vector.load %arg7[%c0_18, %c0_19] : memref<128x128xbf16, #tpu.memory_space<vmem>>, vector<128x128xbf16>
    tpu.vector_store %arg7[%c0_18, %c0_19], %29 {strides = array<i32>} : memref<128x128xbf16, #tpu.memory_space<vmem>>, vector<128x128xbf16>,
    return
  }
  func.func @transform_0(%arg0: i32) -> (i32, i32) {
    %c0_i32 = arith.constant 0 : i32
    %c0_i32_0 = arith.constant 0 : i32
    return %arg0, %c0_i32 : i32, i32
  }
  func.func @transform_1(%arg0: i32) -> (i32, i32) {
    %c0_i32 = arith.constant 0 : i32
    %c0_i32_0 = arith.constant 0 : i32
    return %arg0, %c0_i32 : i32, i32
  }
  func.func @transform_2(%arg0: i32) -> (i32, i32) {
    %c0_i32 = arith.constant 0 : i32
    %c0_i32_0 = arith.constant 0 : i32
    return %arg0, %c0_i32 : i32, i32
  }
  func.func @transform_3(%arg0: i32) -> (i32, i32) {
    %c0_i32 = arith.constant 0 : i32
    %c0_i32_0 = arith.constant 0 : i32
    return %arg0, %c0_i32 : i32, i32
  }
  func.func @transform_4(%arg0: i32) -> (i32, i32) {
    %c0_i32 = arith.constant 0 : i32
    %c0_i32_0 = arith.constant 0 : i32
    %c0_i32_1 = arith.constant 0 : i32
    return %c0_i32, %c0_i32_0 : i32, i32
  }
  func.func @transform_5(%arg0: i32) -> (i32, i32) {
    %c0_i32 = arith.constant 0 : i32
    %c0_i32_0 = arith.constant 0 : i32
    %c0_i32_1 = arith.constant 0 : i32
    return %c0_i32, %c0_i32_0 : i32, i32
  }
  func.func @transform_6(%arg0: i32) -> (i32, i32) {
    %c0_i32 = arith.constant 0 : i32
    %c0_i32_0 = arith.constant 0 : i32
    return %arg0, %c0_i32 : i32, i32
  }
}

</mosaic_0001>

<bundles_post_ra>
// kernel: tpu_custom_call.1
= control target key start
LH: loop header
LB: loop body
LE: loop exit
PB: predicated region body
PF: predicated region fallthrough
CT: control target
= control target key end

     0   :  { %11 = vsyncpa [#allocation3], 0  ;;  %s1789_s0 = inlined_call_operand.hbm [shape: bf16[128,128], index: 0, kind: input, shape index: {}]   ;;  %s1790_s1 = inlined_call_operand.hbm [shape: bf16[128,128], index: 1, kind: input, shape index: {}]   ;;  %s1791_s2 = inlined_call_operand.hbm [shape: bf16[128,128], index: 2, kind: input, shape index: {}]   ;;  %s1792_s3 = inlined_call_operand.hbm [shape: bf16[128,128], index: 3, kind: input, shape index: {}]   ;;  %s1793_s4 = inlined_call_operand.hbm [shape: bf16[128,128], index: 4, kind: input, shape index: {}]   ;;  %s1794_s5 = inlined_call_operand.vmem [shape: f32[1,128], index: 5, kind: input, shape index: {}]   ;;  %s1795_s6 = inlined_call_operand.hbm [shape: bf16[128,128], index: 6, kind: output, shape index: {}]  }
   0x1   :  { %12 = vsyncpa [#allocation6], 0 }
   0x2   :  { %13 = vsyncpa [#allocation9], 0 }
   0x3   :  { %14 = vsyncpa [#allocation4], 0  ;;  %s1507_s21 = smov [#allocation5]   ;;  %s1508_s23 = smov [#allocation8]  }
   0x4   :  { %s32_s22 = sshll.u32 %s1507_s21, 4  ;;  %s56_s24 = sshll.u32 %s1508_s23, 4  ;;  %s33_s22 = int_to_ptr.vmem [resolvable:$true] %s32_s22  ;;  %s57_s24 = int_to_ptr.vmem [resolvable:$true] %s56_s24 }
   0x5   :  { %s1387_s25 = scalar_lea.vmem %s33_s22, 1024  ;;  %p1392_p1 = scmp.lt.s32.totalorder %s33_s22, %s33_s22 }
   0x6   :  { %p1388_p0 = scmp.ne.s32.totalorder %s33_s22, %s1387_s25  ;;  %p1393_p2 = scmp.lt.s32.totalorder %s1387_s25, %s1387_s25 }
   0x8   :  { %p1394_p3 = por %p1393_p2, %p1392_p1 }
   0xa   :  { %p1395_p4 = pnand %p1394_p3, %p1388_p0 }
   0xc   :  { %1398 = shalt.err (!%p1395_p4)
}
   0xd   :  { %s1509_s26 = smov 64   ;;  %s1510_s27 = smov 4  }
   0xe   :  { %38 = dma.hbm_to_vmem [thread:$0]  %s1790_s1, 1024, %s33_s22, [#allocation6], %s1509_s26, %s1509_s26, %s1510_s27  }
   0xf   :  { %s1407_s30 = scalar_lea.vmem %s57_s24, 1024  ;;  %p1412_p6 = scmp.lt.s32.totalorder %s57_s24, %s57_s24 }
  0x10   :  { %p1408_p5 = scmp.ne.s32.totalorder %s57_s24, %s1407_s30  ;;  %p1413_p7 = scmp.lt.s32.totalorder %s1407_s30, %s1407_s30 }
  0x12   :  { %p1414_p8 = por %p1413_p7, %p1412_p6 }
  0x14   :  { %p1415_p9 = pnand %p1414_p8, %p1408_p5 }
  0x16   :  { %1418 = shalt.err (!%p1415_p9)
}
  0x17   :  { %62 = dma.hbm_to_vmem [thread:$0]  %s1792_s3, 1024, %s57_s24, [#allocation9], %s1509_s26, %s1509_s26, %s1510_s27  }
  0x18   :  { %s1511_s9 = smov [#allocation2]   ;;  %s1512_s11 = smov [#allocation7]  }
  0x19   :  { %s20_s10 = sshll.u32 %s1511_s9, 4  ;;  %s44_s12 = sshll.u32 %s1512_s11, 4  ;;  %s21_s10 = int_to_ptr.vmem [resolvable:$true] %s20_s10  ;;  %s45_s12 = int_to_ptr.vmem [resolvable:$true] %s44_s12 }
  0x1a   :  { %s1427_s1 = scalar_lea.vmem %s21_s10, 1024  ;;  %p1432_p11 = scmp.lt.s32.totalorder %s21_s10, %s21_s10 }
  0x1b   :  { %p1428_p10 = scmp.ne.s32.totalorder %s21_s10, %s1427_s1  ;;  %p1433_p12 = scmp.lt.s32.totalorder %s1427_s1, %s1427_s1 }
  0x1d   :  { %p1434_p13 = por %p1433_p12, %p1432_p11 }
  0x1f   :  { %p1435_p0 = pnand %p1434_p13, %p1428_p10 }
  0x21   :  { %1438 = shalt.err (!%p1435_p0)
}
  0x22   :  { %26 = dma.hbm_to_vmem [thread:$0]  %s1789_s0, 1024, %s21_s10, [#allocation3], %s1509_s26, %s1509_s26, %s1510_s27  }
  0x23   :  { %s1447_s3 = scalar_lea.vmem %s45_s12, 1024  ;;  %p1452_p2 = scmp.lt.s32.totalorder %s45_s12, %s45_s12 }
  0x24   :  { %p1448_p1 = scmp.ne.s32.totalorder %s45_s12, %s1447_s3  ;;  %p1453_p3 = scmp.lt.s32.totalorder %s1447_s3, %s1447_s3 }
  0x26   :  { %p1454_p4 = por %p1453_p3, %p1452_p2 }
  0x28   :  { %p1455_p5 = pnand %p1454_p4, %p1448_p1 }
  0x2a   :  { %1458 = shalt.err (!%p1455_p5)
}
  0x2b   :  { %50 = dma.hbm_to_vmem [thread:$0]  %s1791_s2, 1024, %s45_s12, [#allocation6], %s1509_s26, %s1509_s26, %s1510_s27  }
  0x2c   :  { %s1513_s17 = smov [#allocation10]  }
  0x2d   :  { %s68_s18 = sshll.u32 %s1513_s17, 4  ;;  %s69_s18 = int_to_ptr.vmem [resolvable:$true] %s68_s18 }
  0x2e   :  { %s1467_s19 = scalar_lea.vmem %s69_s18, 1024  ;;  %p1472_p7 = scmp.lt.s32.totalorder %s69_s18, %s69_s18 }
  0x2f   :  { %p1468_p6 = scmp.ne.s32.totalorder %s69_s18, %s1467_s19  ;;  %p1473_p8 = scmp.lt.s32.totalorder %s1467_s19, %s1467_s19 }
  0x31   :  { %p1474_p9 = por %p1473_p8, %p1472_p7 }
  0x33   :  { %p1475_p10 = pnand %p1474_p9, %p1468_p6 }
  0x35   :  { %1478 = shalt.err (!%p1475_p10)
}
  0x36   :  { %74 = dma.hbm_to_vmem [thread:$0]  %s1793_s4, 1024, %s69_s18, [#allocation9], %s1509_s26, %s1509_s26, %s1510_s27  }
  0x37   :  { %1499 = dma.done.wait [#allocation3], 1024  }
  0x38   :  { %1500 = vsyncadd [#allocation3], 4294966272 }
  0x39   :  { %1501 = dma.done.wait [#allocation6], 2048  }
  0x3a   :  { %1502 = vsyncadd [#allocation6], 4294965248 }
  0x3b   :  { %1503 = dma.done.wait [#allocation9], 2048  }
  0x3c   :  { %1504 = vsyncadd [#allocation9], 4294965248  ;;  %v1339_v0 = vld [vmem:[#allocation10 + $0x38] sm:$0xff]   ;;  %v1340_v1 = vld [vmem:[#allocation10 + $0x30] sm:$0xff]  }
  0x3d   :  { %1203 = vmatprep.subr.bf16.mxu0 %v1339_v0  ;;  %1235 = vmatprep.subr.bf16.mxu1 %v1339_v0  ;;  %v1341_v2 = vld [vmem:[#allocation10 + $0x28] sm:$0xff]   ;;  %v1580_v3 = vld [vmem:[#allocation10 + $0x20] sm:$0xff]   ;;  %v1584_v6 = vld [vmem:[#allocation10 + $0x18] sm:$0xff]  }
  0x3e   :  { %1204 = vmatpush3.bf16.msra.mxu0 %v1339_v0  ;;  %1236 = vmatpush3.bf16.msra.mxu1 %v1339_v0  ;;  %v1347_v4 = vld [vmem:[#allocation2] sm:$0xff]   ;;  %v1590_v7 = vld [vmem:[#allocation10 + $0x10] sm:$0xff]   ;;  %v1596_v8 = vld [vmem:[#allocation10 + $0x8] sm:$0xff]  }
  0x3f   :  { %1205 = vmatprep.subr.bf16.mxu0 %v1340_v1  ;;  %1237 = vmatprep.subr.bf16.mxu1 %v1340_v1  ;;  %v1348_v5 = vld [vmem:[#allocation5] sm:$0xff]   ;;  %v1349_v10 = vld [vmem:[#allocation2 + $0x8] sm:$0xff]   ;;  %v1351_v12 = vld [vmem:[#allocation2 + $0x10] sm:$0xff]  }
  0x40   :  { %1219 = vmatprep.mubr.bf16.mxu0 %v1347_v4  ;;  %1251 = vmatprep.mubr.bf16.mxu1 %v1348_v5  ;;  %v1602_v9 = vld [vmem:[#allocation10] sm:$0xff]   ;;  %v1350_v11 = vld [vmem:[#allocation5 + $0x8] sm:$0xff]   ;;  %v1352_v13 = vld [vmem:[#allocation5 + $0x10] sm:$0xff]  }
  0x41   :  { %v1353_v14 = vld [vmem:[#allocation2 + $0x18] sm:$0xff]   ;;  %v1355_v16 = vld [vmem:[#allocation2 + $0x20] sm:$0xff]   ;;  %v1357_v18 = vld [vmem:[#allocation2 + $0x28] sm:$0xff]  }
  0x42   :  { %1206 = vmatpush3.bf16.msra.mxu0 %v1340_v1  ;;  %1238 = vmatpush3.bf16.msra.mxu1 %v1340_v1  ;;  %v1354_v15 = vld [vmem:[#allocation5 + $0x18] sm:$0xff]   ;;  %v1356_v17 = vld [vmem:[#allocation5 + $0x20] sm:$0xff]   ;;  %v1358_v19 = vld [vmem:[#allocation5 + $0x28] sm:$0xff]  }
  0x43   :  { %1207 = vmatprep.subr.bf16.mxu0 %v1341_v2  ;;  %1239 = vmatprep.subr.bf16.mxu1 %v1341_v2  ;;  %v1359_v20 = vld [vmem:[#allocation2 + $0x30] sm:$0xff]   ;;  %v1361_v22 = vld [vmem:[#allocation2 + $0x38] sm:$0xff]   ;;  %v1363_v24 = vld [vmem:[#allocation7] sm:$0xff]  }
  0x44   :  { %v1360_v21 = vld [vmem:[#allocation5 + $0x30] sm:$0xff]   ;;  %v1362_v23 = vld [vmem:[#allocation5 + $0x38] sm:$0xff]   ;;  %v1364_v25 = vld [vmem:[#allocation8] sm:$0xff]  }
  0x45   :  { %v1365_v26 = vld [vmem:[#allocation7 + $0x8] sm:$0xff]   ;;  %v1367_v28 = vld [vmem:[#allocation7 + $0x10] sm:$0xff]   ;;  %v1369_v30 = vld [vmem:[#allocation7 + $0x18] sm:$0xff]  }
  0x46   :  { %1208 = vmatpush3.bf16.msra.mxu0 %v1341_v2  ;;  %1240 = vmatpush3.bf16.msra.mxu1 %v1341_v2  ;;  %v1366_v27 = vld [vmem:[#allocation8 + $0x8] sm:$0xff]   ;;  %v1368_v29 = vld [vmem:[#allocation8 + $0x10] sm:$0xff]   ;;  %v1370_v31 = vld [vmem:[#allocation8 + $0x18] sm:$0xff]  }
  0x47   :  { %1209 = vmatprep.subr.bf16.mxu0 %v1580_v3  ;;  %1241 = vmatprep.subr.bf16.mxu1 %v1580_v3  ;;  %v1371_v32 = vld [vmem:[#allocation7 + $0x20] sm:$0xff]   ;;  %v1373_v34 = vld [vmem:[#allocation7 + $0x28] sm:$0xff]   ;;  %v1375_v36 = vld [vmem:[#allocation7 + $0x30] sm:$0xff]  }
  0x48   :  { %v1372_v33 = vld [vmem:[#allocation8 + $0x20] sm:$0xff]   ;;  %v1374_v35 = vld [vmem:[#allocation8 + $0x28] sm:$0xff]   ;;  %v1376_v37 = vld [vmem:[#allocation8 + $0x30] sm:$0xff]  }
  0x49   :  { %v1377_v38 = vld [vmem:[#allocation7 + $0x38] sm:$0xff]   ;;  %v1633_v58 = vld [vmem:[%s1794_s5] ss:$0 sm:$0xff]  ;;  %s1514_s5 = smov [#allocation11]  }
  0x4a   :  { %1210 = vmatpush3.bf16.msra.mxu0 %v1580_v3  ;;  %1242 = vmatpush3.bf16.msra.mxu1 %v1580_v3  ;;  %v1378_v39 = vld [vmem:[#allocation8 + $0x38] sm:$0xff]   ;;  %s1005_s21 = sshll.u32 %s1514_s5, 4  ;;  %s1006_s21 = int_to_ptr.vmem [resolvable:$true] %s1005_s21 }
  0x4b   :  { %1211 = vmatprep.subr.bf16.mxu0 %v1584_v6  ;;  %1243 = vmatprep.subr.bf16.mxu1 %v1584_v6  ;;  %s1479_s22 = scalar_lea.vmem %s1006_s21, 1024  ;;  %p1484_p12 = scmp.lt.s32.totalorder %s1006_s21, %s1006_s21 }
  0x4c   :  { %p1480_p11 = scmp.ne.s32.totalorder %s1006_s21, %s1479_s22  ;;  %p1485_p13 = scmp.lt.s32.totalorder %s1479_s22, %s1479_s22 }
  0x4e   :  { %1212 = vmatpush3.bf16.msra.mxu0 %v1584_v6  ;;  %1244 = vmatpush3.bf16.msra.mxu1 %v1584_v6  ;;  %p1486_p0 = por %p1485_p13, %p1484_p12 }
  0x4f   :  { %1213 = vmatprep.subr.bf16.mxu0 %v1590_v7  ;;  %1245 = vmatprep.subr.bf16.mxu1 %v1590_v7 }
  0x50   :  { %p1487_p1 = pnand %p1486_p0, %p1480_p11 }
  0x52   :  { %1214 = vmatpush3.bf16.msra.mxu0 %v1590_v7  ;;  %1246 = vmatpush3.bf16.msra.mxu1 %v1590_v7 }
  0x53   :  { %1215 = vmatprep.subr.bf16.mxu0 %v1596_v8  ;;  %1247 = vmatprep.subr.bf16.mxu1 %v1596_v8 }
  0x56   :  { %1216 = vmatpush3.bf16.msra.mxu0 %v1596_v8  ;;  %1248 = vmatpush3.bf16.msra.mxu1 %v1596_v8 }
  0x57   :  { %1217 = vmatprep.subr.bf16.mxu0 %v1602_v9  ;;  %1249 = vmatprep.subr.bf16.mxu1 %v1602_v9 }
  0x5a   :  { %1218 = vmatpush3.bf16.msra.mxu0 %v1602_v9  ;;  %1250 = vmatpush3.bf16.msra.mxu1 %v1602_v9 }
  0x5b   :  { %1267 = vmatprep.subr.bf16.mxu0 %v1339_v0  ;;  %1299 = vmatprep.subr.bf16.mxu1 %v1339_v0 }
  0x5d   :  { %1220 = vmatmul.mubr.bf16.vlgmr.msra.gmra.mxu0 %v1349_v10  ;;  %1252 = vmatmul.mubr.bf16.vlgmr.msra.gmra.mxu1 %v1350_v11 }
  0x5e   :  { %1268 = vmatpush3.bf16.msra.mxu0 %v1339_v0  ;;  %1300 = vmatpush3.bf16.msra.mxu1 %v1339_v0 }
  0x5f   :  { %1269 = vmatprep.subr.bf16.mxu0 %v1340_v1  ;;  %1301 = vmatprep.subr.bf16.mxu1 %v1340_v1 }
  0x60   :  { %1223 = vmatprep.mubr.bf16.mxu0 %v1351_v12  ;;  %1255 = vmatprep.mubr.bf16.mxu1 %v1352_v13 }
  0x62   :  { %1270 = vmatpush3.bf16.msra.mxu0 %v1340_v1  ;;  %1302 = vmatpush3.bf16.msra.mxu1 %v1340_v1 }
  0x63   :  { %1271 = vmatprep.subr.bf16.mxu0 %v1341_v2  ;;  %1303 = vmatprep.subr.bf16.mxu1 %v1341_v2 }
  0x65   :  { %1224 = vmatmul.mubr.bf16.gmra.mxu0 %v1353_v14  ;;  %1256 = vmatmul.mubr.bf16.gmra.mxu1 %v1354_v15 }
  0x66   :  { %1272 = vmatpush3.bf16.msra.mxu0 %v1341_v2  ;;  %1304 = vmatpush3.bf16.msra.mxu1 %v1341_v2 }
  0x67   :  { %1273 = vmatprep.subr.bf16.mxu0 %v1580_v3  ;;  %1305 = vmatprep.subr.bf16.mxu1 %v1580_v3 }
  0x68   :  { %1227 = vmatprep.mubr.bf16.mxu0 %v1355_v16  ;;  %1259 = vmatprep.mubr.bf16.mxu1 %v1356_v17 }
  0x6a   :  { %1274 = vmatpush3.bf16.msra.mxu0 %v1580_v3  ;;  %1306 = vmatpush3.bf16.msra.mxu1 %v1580_v3 }
  0x6b   :  { %1275 = vmatprep.subr.bf16.mxu0 %v1584_v6  ;;  %1307 = vmatprep.subr.bf16.mxu1 %v1584_v6 }
  0x6d   :  { %1228 = vmatmul.mubr.bf16.gmra.mxu0 %v1357_v18  ;;  %1260 = vmatmul.mubr.bf16.gmra.mxu1 %v1358_v19 }
  0x6e   :  { %1276 = vmatpush3.bf16.msra.mxu0 %v1584_v6  ;;  %1308 = vmatpush3.bf16.msra.mxu1 %v1584_v6 }
  0x6f   :  { %1277 = vmatprep.subr.bf16.mxu0 %v1590_v7  ;;  %1309 = vmatprep.subr.bf16.mxu1 %v1590_v7 }
  0x70   :  { %1231 = vmatprep.mubr.bf16.mxu0 %v1359_v20  ;;  %1263 = vmatprep.mubr.bf16.mxu1 %v1360_v21 }
  0x72   :  { %1278 = vmatpush3.bf16.msra.mxu0 %v1590_v7  ;;  %1310 = vmatpush3.bf16.msra.mxu1 %v1590_v7 }
  0x73   :  { %1279 = vmatprep.subr.bf16.mxu0 %v1596_v8  ;;  %1311 = vmatprep.subr.bf16.mxu1 %v1596_v8 }
  0x75   :  { %1232 = vmatmul.mubr.bf16.gmra.mxu0 %v1361_v22  ;;  %1264 = vmatmul.mubr.bf16.gmra.mxu1 %v1362_v23 }
  0x76   :  { %1280 = vmatpush3.bf16.msra.mxu0 %v1596_v8  ;;  %1312 = vmatpush3.bf16.msra.mxu1 %v1596_v8 }
  0x77   :  { %1281 = vmatprep.subr.bf16.mxu0 %v1602_v9  ;;  %1313 = vmatprep.subr.bf16.mxu1 %v1602_v9 }
  0x78   :  { %1283 = vmatprep.mubr.bf16.mxu0 %v1363_v24  ;;  %1315 = vmatprep.mubr.bf16.mxu1 %v1364_v25 }
  0x7a   :  { %1282 = vmatpush3.bf16.msra.mxu0 %v1602_v9  ;;  %1314 = vmatpush3.bf16.msra.mxu1 %v1602_v9 }
  0x7d   :  { %1284 = vmatmul.mubr.bf16.vlgmr.msra.gmra.mxu0 %v1365_v26  ;;  %1316 = vmatmul.mubr.bf16.vlgmr.msra.gmra.mxu1 %v1366_v27 }
  0x7e   :  { %1287 = vmatprep.mubr.bf16.mxu0 %v1367_v28  ;;  %1319 = vmatprep.mubr.bf16.mxu1 %v1368_v29 }
  0x85   :  { %1288 = vmatmul.mubr.bf16.gmra.mxu0 %v1369_v30  ;;  %1320 = vmatmul.mubr.bf16.gmra.mxu1 %v1370_v31 }
  0x86   :  { %1291 = vmatprep.mubr.bf16.mxu0 %v1371_v32  ;;  %1323 = vmatprep.mubr.bf16.mxu1 %v1372_v33 }
  0x8d   :  { %1292 = vmatmul.mubr.bf16.gmra.mxu0 %v1373_v34  ;;  %1324 = vmatmul.mubr.bf16.gmra.mxu1 %v1374_v35 }
  0x8e   :  { %1295 = vmatprep.mubr.bf16.mxu0 %v1375_v36  ;;  %1327 = vmatprep.mubr.bf16.mxu1 %v1376_v37 }
  0x95   :  { %1296 = vmatmul.mubr.bf16.gmra.mxu0 %v1377_v38  ;;  %1328 = vmatmul.mubr.bf16.gmra.mxu1 %v1378_v39 }
 0x11d   :  { %v1221_v40 = vpop.f32.mrf.mxu0  ;;  %v1253_v41 = vpop.f32.mrf.mxu1 }
 0x11e   :  { %v271_v61 = vadd.f32 %v1221_v40, %v1633_v58  ;;  %v448_v62 = vadd.f32 %v1253_v41, %v1633_v58 }
 0x11f   :  { %v262_v42 = vpop.f32.mrf.mxu0  ;;  %v439_v43 = vpop.f32.mrf.mxu1 }
 0x120   :  { %v263_v1 = vadd.f32 %v1633_v58, %v262_v42  ;;  %v440_v4 = vadd.f32 %v1633_v58, %v439_v43  ;;  %v327_v7 = vmax.f32 %v271_v61, 0.0  ;;  %v504_v8 = vmax.f32 %v448_v62, 0.0 }
 0x121   :  { %v1222_v44 = vpop.f32.mrf.mxu0  ;;  %v1254_v45 = vpop.f32.mrf.mxu1 }
 0x122   :  { %v274_v5 = vadd.f32 %v1222_v44, %v1633_v58  ;;  %v451_v6 = vadd.f32 %v1254_v45, %v1633_v58  ;;  %v325_v13 = vmax.f32 %v263_v1, 0.0  ;;  %v502_v22 = vmax.f32 %v440_v4, 0.0 }
 0x123   :  { %v265_v46 = vpop.f32.mrf.mxu0  ;;  %v442_v47 = vpop.f32.mrf.mxu1  ;;  %v1662_v26 = vmax.f32 %v327_v7, %v504_v8 }
 0x124   :  { %v266_v9 = vadd.f32 %v1633_v58, %v265_v46  ;;  %v443_v10 = vadd.f32 %v1633_v58, %v442_v47  ;;  %v328_v23 = vmax.f32 %v274_v5, 0.0  ;;  %v505_v24 = vmax.f32 %v451_v6, 0.0 }
 0x125   :  { %v1225_v48 = vpop.f32.mrf.mxu0  ;;  %v1257_v49 = vpop.f32.mrf.mxu1  ;;  %v1675_v42 = vmax.f32 %v325_v13, %v502_v22 }
 0x126   :  { %v287_v14 = vadd.f32 %v1225_v48, %v1633_v58  ;;  %v464_v15 = vadd.f32 %v1257_v49, %v1633_v58  ;;  %v326_v27 = vmax.f32 %v266_v9, 0.0  ;;  %v503_v28 = vmax.f32 %v443_v10, 0.0 }
 0x127   :  { %v278_v50 = vpop.f32.mrf.mxu0  ;;  %v455_v51 = vpop.f32.mrf.mxu1  ;;  %v1677_v43 = vmax.f32 %v328_v23, %v505_v24 }
 0x128   :  { %v279_v16 = vadd.f32 %v1633_v58, %v278_v50  ;;  %v456_v17 = vadd.f32 %v1633_v58, %v455_v51  ;;  %v331_v32 = vmax.f32 %v287_v14, 0.0  ;;  %v508_v33 = vmax.f32 %v464_v15, 0.0 }
 0x129   :  { %v1226_v52 = vpop.f32.mrf.mxu0  ;;  %v1258_v53 = vpop.f32.mrf.mxu1 }
 0x12a   :  { %v290_v18 = vadd.f32 %v1226_v52, %v1633_v58  ;;  %v467_v19 = vadd.f32 %v1258_v53, %v1633_v58  ;;  %v329_v36 = vmax.f32 %v279_v16, 0.0  ;;  %v506_v37 = vmax.f32 %v456_v17, 0.0 }
 0x12b   :  { %v281_v54 = vpop.f32.mrf.mxu0  ;;  %v458_v55 = vpop.f32.mrf.mxu1 }
 0x12c   :  { %v282_v25 = vadd.f32 %v1633_v58, %v281_v54  ;;  %v459_v29 = vadd.f32 %v1633_v58, %v458_v55  ;;  %v332_v38 = vmax.f32 %v290_v18, 0.0  ;;  %v509_v39 = vmax.f32 %v467_v19, 0.0 }
 0x12d   :  { %v1229_v56 = vpop.f32.mrf.mxu0  ;;  %v1261_v57 = vpop.f32.mrf.mxu1 }
 0x12e   :  { %v303_v34 = vadd.f32 %v1229_v56, %v1633_v58  ;;  %v480_v35 = vadd.f32 %v1261_v57, %v1633_v58  ;;  %v330_v44 = vmax.f32 %v282_v25, 0.0  ;;  %v507_v46 = vmax.f32 %v459_v29, 0.0 }
 0x12f   :  { %v294_v59 = vpop.f32.mrf.mxu0  ;;  %v471_v60 = vpop.f32.mrf.mxu1  ;;  %v1685_v56 = vmax.f32 %v326_v27, %v503_v28  ;;  %v1687_v57 = vmax.f32 %v331_v32, %v508_v33  ;;  %v1691_v61 = vmax.f32 %v332_v38, %v509_v39 }
 0x130   :  { %v295_v45 = vadd.f32 %v1633_v58, %v294_v59  ;;  %v472_v47 = vadd.f32 %v1633_v58, %v471_v60  ;;  %v335_v52 = vmax.f32 %v303_v34, 0.0  ;;  %v512_v53 = vmax.f32 %v480_v35, 0.0 }
 0x131   :  { %v1230_v63 = vpop.f32.mrf.mxu0  ;;  %v1262_v0 = vpop.f32.mrf.mxu1  ;;  %v1689_v59 = vmax.f32 %v329_v36, %v506_v37  ;;  %v1695_v13 = vmax.f32 %v330_v44, %v507_v46 }
 0x132   :  { %v306_v48 = vadd.f32 %v1230_v63, %v1633_v58  ;;  %v483_v49 = vadd.f32 %v1262_v0, %v1633_v58  ;;  %v333_v63 = vmax.f32 %v295_v45, 0.0  ;;  %v510_v5 = vmax.f32 %v472_v47, 0.0 }
 0x133   :  { %v1638_v2 = vpop.f32.mrf.mxu0  ;;  %v1640_v3 = vpop.f32.mrf.mxu1  ;;  %v1697_v14 = vmax.f32 %v335_v52, %v512_v53 }
 0x134   :  { %v336_v6 = vmax.f32 %v306_v48, 0.0  ;;  %v513_v7 = vmax.f32 %v483_v49, 0.0  ;;  %v298_v17 = vadd.f32 %v1633_v58, %v1638_v2  ;;  %v475_v18 = vadd.f32 %v1633_v58, %v1640_v3 }
 0x135   :  { %v1647_v11 = vpop.f32.mrf.mxu0  ;;  %v1649_v12 = vpop.f32.mrf.mxu1  ;;  %v1706_v32 = vmax.f32 %v333_v63, %v510_v5 }
 0x136   :  { %v1708_v33 = vmax.f32 %v336_v6, %v513_v7  ;;  %v1712_v34 = vadd.f32 %v1647_v11, %v1633_v58  ;;  %v334_v44 = vmax.f32 %v298_v17, 0.0  ;;  %v1719_v45 = vadd.f32 %v1649_v12, %v1633_v58 }
 0x137   :  { %v1657_v20 = vpop.f32.mrf.mxu0  ;;  %v1659_v21 = vpop.f32.mrf.mxu1  ;;  %v511_v49 = vmax.f32 %v475_v18, 0.0 }
 0x138   :  { %v339_v12 = vmax.f32 %v1712_v34, 0.0 }
 0x139   :  { %v1665_v30 = vpop.f32.mrf.mxu0  ;;  %v1667_v31 = vpop.f32.mrf.mxu1 }
 0x13b   :  { %v1671_v40 = vpop.f32.mrf.mxu0  ;;  %v1673_v41 = vpop.f32.mrf.mxu1 }
 0x13d   :  { %v1285_v50 = vpop.f32.mrf.mxu0  ;;  %v1317_v51 = vpop.f32.mrf.mxu1 }
 0x13e   :  { %v641_v54 = vadd.f32 %v1285_v50, %v1633_v58  ;;  %v818_v55 = vadd.f32 %v1317_v51, %v1633_v58 }
 0x13f   :  { %v632_v60 = vpop.f32.mrf.mxu0  ;;  %v809_v62 = vpop.f32.mrf.mxu1 }
 0x140   :  { %v697_v0 = vmax.f32 %v641_v54, 0.0  ;;  %v874_v1 = vmax.f32 %v818_v55, 0.0  ;;  %v633_v4 = vadd.f32 %v1633_v58, %v632_v60  ;;  %v810_v8 = vadd.f32 %v1633_v58, %v809_v62 }
 0x141   :  { %v1286_v9 = vpop.f32.mrf.mxu0  ;;  %v1318_v10 = vpop.f32.mrf.mxu1 }
 0x142   :  { %v644_v15 = vadd.f32 %v1286_v9, %v1633_v58  ;;  %v821_v16 = vadd.f32 %v1318_v10, %v1633_v58  ;;  %v695_v19 = vmax.f32 %v633_v4, 0.0  ;;  %v872_v22 = vmax.f32 %v810_v8, 0.0 }
 0x143   :  { %v635_v23 = vpop.f32.mrf.mxu0  ;;  %v812_v24 = vpop.f32.mrf.mxu1  ;;  %v890_v25 = vmax.f32 %v697_v0, %v874_v1  ;;  %v1732_v9 = vadd.f32 %v1633_v58, %v1657_v20  ;;  %v1738_v20 = vmax.f32 %v334_v44, %v511_v49 }
 0x144   :  { %v698_v27 = vmax.f32 %v644_v15, 0.0  ;;  %v875_v28 = vmax.f32 %v821_v16, 0.0  ;;  %v636_v29 = vadd.f32 %v1633_v58, %v635_v23  ;;  %v813_v2 = vadd.f32 %v1633_v58, %v812_v24 }
 0x145   :  { %v1289_v3 = vpop.f32.mrf.mxu0  ;;  %v1321_v35 = vpop.f32.mrf.mxu1  ;;  %v888_v46 = vmax.f32 %v695_v19, %v872_v22  ;;  %v906_v50 = vmax.f32 %v1662_v26, %v890_v25 }
 0x146   :  { %v891_v36 = vmax.f32 %v698_v27, %v875_v28  ;;  %v696_v37 = vmax.f32 %v636_v29, 0.0  ;;  %v657_v38 = vadd.f32 %v1289_v3, %v1633_v58  ;;  %v834_v39 = vadd.f32 %v1321_v35, %v1633_v58 }
 0x147   :  { %v873_v47 = vmax.f32 %v813_v2, 0.0  ;;  %v648_v48 = vpop.f32.mrf.mxu0  ;;  %v825_v11 = vpop.f32.mrf.mxu1  ;;  %v904_v5 = vmax.f32 %v1675_v42, %v888_v46  ;;  %v516_v28 = vmax.f32 %v1719_v45, 0.0  ;;  %v1743_v29 = vadd.f32 %v1633_v58, %v1659_v21 }
 0x148   :  { %v907_v51 = vmax.f32 %v1677_v43, %v891_v36  ;;  %v649_v52 = vadd.f32 %v1633_v58, %v648_v48  ;;  %v701_v54 = vmax.f32 %v657_v38, 0.0  ;;  %v878_v55 = vmax.f32 %v834_v39, 0.0 }
 0x149   :  { %v889_v53 = vmax.f32 %v696_v37, %v873_v47  ;;  %v826_v60 = vadd.f32 %v1633_v58, %v825_v11  ;;  %v1290_v62 = vpop.f32.mrf.mxu0  ;;  %v1322_v63 = vpop.f32.mrf.mxu1  ;;  %v337_v46 = vmax.f32 %v1732_v9, 0.0 }
 0x14a   :  { %v1100_v0 = vpack.c.bf16 %v907_v51, %v906_v50  ;;  %v699_v1 = vmax.f32 %v649_v52, 0.0  ;;  %v660_v4 = vadd.f32 %v1290_v62, %v1633_v58  ;;  %v837_v6 = vadd.f32 %v1322_v63, %v1633_v58 }
 0x14b   :  { %v905_v26 = vmax.f32 %v1685_v56, %v889_v53  ;;  %v876_v43 = vmax.f32 %v826_v60, 0.0  ;;  %v651_v7 = vpop.f32.mrf.mxu0  ;;  %v828_v8 = vpop.f32.mrf.mxu1  ;;  %v894_v18 = vmax.f32 %v701_v54, %v878_v55  ;;  %v322_v53 = vadd.f32 %v1665_v30, %v1633_v58 }
 0x14c   :  { %1132 = vst [vmem:[#allocation11 + $0x8] sm:$0xff] %v1100_v0   ;;  %v702_v10 = vmax.f32 %v660_v4, 0.0  ;;  %v652_v15 = vadd.f32 %v1633_v58, %v651_v7  ;;  %v829_v16 = vadd.f32 %v1633_v58, %v828_v8  ;;  %v879_v19 = vmax.f32 %v837_v6, 0.0 }
 0x14d   :  { %v1095_v17 = vpack.c.bf16 %v905_v26, %v904_v5  ;;  %v892_v42 = vmax.f32 %v699_v1, %v876_v43  ;;  %v1293_v56 = vpop.f32.mrf.mxu0  ;;  %v1325_v22 = vpop.f32.mrf.mxu1  ;;  %v910_v44 = vmax.f32 %v1687_v57, %v894_v18 }
 0x14e   :  { %v700_v23 = vmax.f32 %v652_v15, 0.0  ;;  %v877_v24 = vmax.f32 %v829_v16, 0.0  ;;  %v673_v25 = vadd.f32 %v1293_v56, %v1633_v58  ;;  %v850_v27 = vadd.f32 %v1325_v22, %v1633_v58 }
 0x14f   :  { %1096 = vst [vmem:[#allocation11] sm:$0xff] %v1095_v17   ;;  %v895_v2 = vmax.f32 %v702_v10, %v879_v19  ;;  %v664_v3 = vpop.f32.mrf.mxu0  ;;  %v841_v35 = vpop.f32.mrf.mxu1  ;;  %v908_v49 = vmax.f32 %v1689_v59, %v892_v42  ;;  %v514_v59 = vmax.f32 %v1743_v29, 0.0  ;;  %v340_v10 = vmax.f32 %v322_v53, 0.0 }
 0x150   :  { %v893_v36 = vmax.f32 %v700_v23, %v877_v24  ;;  %v705_v37 = vmax.f32 %v673_v25, 0.0  ;;  %v882_v38 = vmax.f32 %v850_v27, 0.0  ;;  %v665_v39 = vadd.f32 %v1633_v58, %v664_v3 }
 0x151   :  { %v911_v47 = vmax.f32 %v1691_v61, %v895_v2  ;;  %v842_v48 = vadd.f32 %v1633_v58, %v841_v35  ;;  %v1294_v11 = vpop.f32.mrf.mxu0  ;;  %v1326_v21 = vpop.f32.mrf.mxu1  ;;  %v314_v15 = vadd.f32 %v1633_v58, %v1671_v40  ;;  %v491_v42 = vadd.f32 %v1633_v58, %v1673_v41 }
 0x152   :  { %v909_v50 = vmax.f32 %v1695_v13, %v893_v36  ;;  %v703_v51 = vmax.f32 %v665_v39, 0.0  ;;  %v676_v52 = vadd.f32 %v1294_v11, %v1633_v58  ;;  %v853_v57 = vadd.f32 %v1326_v21, %v1633_v58 }
 0x153   :  { %v1110_v54 = vpack.c.bf16 %v911_v47, %v910_v44  ;;  %v880_v55 = vmax.f32 %v842_v48, 0.0  ;;  %v667_v60 = vpop.f32.mrf.mxu0  ;;  %v844_v61 = vpop.f32.mrf.mxu1  ;;  %v898_v63 = vmax.f32 %v705_v37, %v882_v38  ;;  %v499_v13 = vadd.f32 %v1667_v31, %v1633_v58 }
 0x154   :  { %v1105_v62 = vpack.c.bf16 %v909_v50, %v908_v49  ;;  %v706_v0 = vmax.f32 %v676_v52, 0.0  ;;  %v668_v1 = vadd.f32 %v1633_v58, %v667_v60  ;;  %v883_v4 = vmax.f32 %v853_v57, 0.0 }
 0x155   :  { %1134 = vst [vmem:[#allocation11 + $0x18] sm:$0xff] %v1110_v54   ;;  %v845_v30 = vadd.f32 %v1633_v58, %v844_v61  ;;  %v1297_v5 = vpop.f32.mrf.mxu0  ;;  %v1329_v26 = vpop.f32.mrf.mxu1  ;;  %v896_v43 = vmax.f32 %v703_v51, %v880_v55  ;;  %v914_v19 = vmax.f32 %v1697_v14, %v898_v63  ;;  %v517_v2 = vmax.f32 %v499_v13, 0.0 }
 0x156   :  { %1133 = vst [vmem:[#allocation11 + $0x10] sm:$0xff] %v1105_v62   ;;  %v704_v6 = vmax.f32 %v668_v1, 0.0  ;;  %v689_v7 = vadd.f32 %v1297_v5, %v1633_v58  ;;  %v866_v8 = vadd.f32 %v1329_v26, %v1633_v58  ;;  %v899_v16 = vmax.f32 %v706_v0, %v883_v4 }
 0x157   :  { %v881_v17 = vmax.f32 %v845_v30, 0.0  ;;  %v680_v31 = vpop.f32.mrf.mxu0  ;;  %v857_v18 = vpop.f32.mrf.mxu1  ;;  %v912_v3 = vmax.f32 %v1706_v32, %v896_v43  ;;  %v515_v47 = vmax.f32 %v491_v42, 0.0  ;;  %v533_v52 = vmax.f32 %v340_v10, %v517_v2 }
 0x158   :  { %v681_v56 = vadd.f32 %v1633_v58, %v680_v31  ;;  %v858_v22 = vadd.f32 %v1633_v58, %v857_v18  ;;  %v915_v23 = vmax.f32 %v1708_v33, %v899_v16  ;;  %v709_v25 = vmax.f32 %v689_v7, 0.0 }
 0x159   :  { %v897_v24 = vmax.f32 %v704_v6, %v881_v17  ;;  %v886_v27 = vmax.f32 %v866_v8, 0.0  ;;  %v1298_v29 = vpop.f32.mrf.mxu0  ;;  %v1330_v40 = vpop.f32.mrf.mxu1  ;;  %v338_v33 = vmax.f32 %v314_v15, 0.0  ;;  %v530_v57 = vmax.f32 %v337_v46, %v514_v59 }
 0x15a   :  { %v707_v35 = vmax.f32 %v681_v56, 0.0  ;;  %v692_v36 = vadd.f32 %v1298_v29, %v1633_v58  ;;  %v1120_v41 = vpack.c.bf16 %v915_v23, %v914_v19  ;;  %v884_v37 = vmax.f32 %v858_v22, 0.0 }
 0x15b   :  { %v913_v14 = vmax.f32 %v1738_v20, %v897_v24  ;;  %v869_v38 = vadd.f32 %v1330_v40, %v1633_v58  ;;  %v683_v39 = vpop.f32.mrf.mxu0  ;;  %v860_v44 = vpop.f32.mrf.mxu1  ;;  %v902_v49 = vmax.f32 %v709_v25, %v886_v27  ;;  %v532_v20 = vmax.f32 %v339_v12, %v516_v28 }
 0x15c   :  { %v710_v48 = vmax.f32 %v692_v36, 0.0  ;;  %v684_v11 = vadd.f32 %v1633_v58, %v683_v39  ;;  %1136 = vst [vmem:[#allocation11 + $0x28] sm:$0xff] %v1120_v41   ;;  %v861_v50 = vadd.f32 %v1633_v58, %v860_v44  ;;  %v900_v53 = vmax.f32 %v707_v35, %v884_v37 }
 0x15d   :  { %v1115_v21 = vpack.c.bf16 %v913_v14, %v912_v3  ;;  %v887_v32 = vmax.f32 %v869_v38, 0.0  ;;  %v531_v60 = vmax.f32 %v338_v33, %v515_v47  ;;  %v918_v61 = vmax.f32 %v532_v20, %v902_v49 }
 0x15e   :  { %v708_v51 = vmax.f32 %v684_v11, 0.0  ;;  %v885_v55 = vmax.f32 %v861_v50, 0.0  ;;  %v916_v58 = vmax.f32 %v530_v57, %v900_v53 }
 0x15f   :  { %1135 = vst [vmem:[#allocation11 + $0x20] sm:$0xff] %v1115_v21   ;;  %v903_v54 = vmax.f32 %v710_v48, %v887_v32 }
 0x160   :  { %v901_v63 = vmax.f32 %v708_v51, %v885_v55 }
 0x161   :  { %v919_v62 = vmax.f32 %v533_v52, %v903_v54 }
 0x162   :  { %v917_v0 = vmax.f32 %v531_v60, %v901_v63 }
 0x163   :  { %v1130_v45 = vpack.c.bf16 %v919_v62, %v918_v61 }
 0x164   :  { %v1125_v34 = vpack.c.bf16 %v917_v0, %v916_v58 }
 0x165   :  { %1138 = vst [vmem:[#allocation11 + $0x38] sm:$0xff] %v1130_v45  }
 0x166   :  { %1137 = vst [vmem:[#allocation11 + $0x30] sm:$0xff] %v1125_v34  }
 0x167   :  { %1490 = shalt.err (!%p1487_p1)
}
 0x168   :  { %1011 = dma.vmem_to_hbm [thread:$0]  %s1006_s21, 1024, %s1795_s6, [#allocation4], %s1509_s26, %s1509_s26, %s1510_s27  }
 0x169   :  { %1505 = dma.done.wait [#allocation4], 1024  }
 0x16a   :  { %1506 = vsyncadd [#allocation4], 4294966272 }
 0x16b   :  { %1015 = vsyncpa [#allocation3], 1 }
 0x16c   :  { %1016 = vsyncpa [#allocation6], 1 }
 0x16d   :  { %1017 = vsyncpa [#allocation9], 1 }
 0x16e   :  { %1018 = vsyncpa [#allocation4], 1 }

</bundles_post_ra>
